<compile_context>
chip_gen: v7x
topology: tpu7x:2x2x1
jax: 0.10.0
libtpu: 0.0.40
codegen_flags: <defaults>
</compile_context>

<pallas_src>
import functools

import jax
import jax.numpy as jnp
from jax.experimental import pallas as pl
from jax.experimental.pallas import tpu as pltpu

LANE = 128
SUBLANE = 8
MAX_BLOCK_ROWS = 8192      # 8192x128: 4 MiB f32 + 1 MiB int8 per buffer; x2 buffers ~ 10 MiB
EPS = 1e-8
LOG_CLAMP = -100.0         # torch F.binary_cross_entropy clamps log terms at -100


def _cdiv(a, b):
    return -(-a // b)


def _round_up(x, m):
    return ((x + m - 1) // m) * m


def _overlap_loss_kernel(scores_ref, labels_ref, out_ref, acc_ref, *, n, weight):
    """Streaming weighted-BCE + precision/recall with fused scalar epilogue.

    acc_ref (VMEM, f32[5, 8, 128]) tile-wise running sums:
      [0] sum(labels)
      [1] sum(bce)
      [2] sum(bce * labels)
      [3] sum(pred * labels)   (true positives)
      [4] sum(pred)            (predicted positives)
    out_ref (SMEM, f32[4]): [loss, precision, recall, 0] written on the last step.

    Zero-padded tail elements are inert: x=0, y=0 gives bce = -log(1-0) = 0 and
    pred = 0, so no mask stream is needed.
    """
    i = pl.program_id(0)

    @pl.when(i == 0)
    def _init():
        acc_ref[...] = jnp.zeros_like(acc_ref)

    x = scores_ref[...]                        # f32 (block_rows, 128)
    y = labels_ref[...].astype(jnp.float32)    # int8 -> f32, exact for {0, 1}

    # Single-log BCE (exact for binary labels; matches torch's clamped two-log form).
    z = jnp.where(y > 0.5, x, 1.0 - x)
    bce = -jnp.maximum(jnp.log(z), LOG_CLAMP)

    # Reuse one compare for both prediction streams (no pred*y multiply).
    pos_pred = x > 0.5
    pred = jnp.where(pos_pred, 1.0, 0.0)
    tp = jnp.where(pos_pred, y, 0.0)

    def tile_sum(q):
        # (block_rows, 128) -> (8, 128) via pure vreg adds over native (8,128) tiles.
        return jnp.sum(q.reshape(-1, SUBLANE, LANE), axis=0)

    acc_ref[0] += tile_sum(y)
    acc_ref[1] += tile_sum(bce)
    acc_ref[2] += tile_sum(bce * y)
    acc_ref[3] += tile_sum(tp)
    acc_ref[4] += tile_sum(pred)

    @pl.when(i == pl.num_programs(0) - 1)
    def _finalize():
        sum_labels = jnp.sum(acc_ref[0])
        sum_bce = jnp.sum(acc_ref[1])
        sum_pos_bce = jnp.sum(acc_ref[2])
        sum_tp = jnp.sum(acc_ref[3])
        sum_pred = jnp.sum(acc_ref[4])
        sum_neg_bce = sum_bce - sum_pos_bce

        n_f = jnp.float32(n)
        w_neg = sum_labels / n_f                  # mean(labels)
        w_pos = 1.0 - w_neg
        loss = jnp.float32(weight) * (w_pos * sum_pos_bce + w_neg * sum_neg_bce) / n_f

        out_ref[0] = loss
        out_ref[1] = sum_tp / (sum_pred + EPS)    # precision
        out_ref[2] = sum_tp / (sum_labels + EPS)  # recall
        out_ref[3] = 0.0


def _overlap_loss_call(scores2d, labels2d, block_rows, n, weight):
    rows = scores2d.shape[0]
    grid = (rows // block_rows,)
    kernel = functools.partial(_overlap_loss_kernel, n=n, weight=weight)
    return pl.pallas_call(
        kernel,
        out_shape=jax.ShapeDtypeStruct((4,), jnp.float32),
        grid_spec=pltpu.PrefetchScalarGridSpec(
            num_scalar_prefetch=0,
            grid=grid,
            in_specs=[
                pl.BlockSpec((block_rows, LANE), lambda i: (i, 0)),   # f32 scores
                pl.BlockSpec((block_rows, LANE), lambda i: (i, 0)),   # int8 labels
            ],
            out_specs=pl.BlockSpec(memory_space=pltpu.SMEM),
            scratch_shapes=[pltpu.VMEM((5, SUBLANE, LANE), jnp.float32)],
        ),
        compiler_params=pltpu.CompilerParams(
            dimension_semantics=("arbitrary",),   # serial reduction over row blocks
            # Explicit 32 MiB override: ABOVE v5e's 16 MiB scoped default (needed
            # for 8192-row tiles), within physical VMEM on v5e/v6e/v7x.
            vmem_limit_bytes=32 * 1024 * 1024,
        ),
    )(scores2d, labels2d)


@functools.partial(jax.jit, static_argnames=("weight", "max_block_rows"))
def overlap_loss(src_corr_indices, tgt_corr_indices, src_scores, tgt_scores,
                 weight=1.0, max_block_rows=MAX_BLOCK_ROWS):
    """Returns (loss, precision, recall) matching OverlapLoss.forward."""
    n_src = src_scores.shape[0]
    n_tgt = tgt_scores.shape[0]
    n = n_src + n_tgt

    # Tile geometry: bound tail padding to <32 rows per block and keep
    # block_rows a multiple of 32 (int8 (32,128) min tile).
    rows_needed = max(1, _cdiv(n, LANE))
    num_blocks = _cdiv(rows_needed, max_block_rows)
    block_rows = _round_up(_cdiv(rows_needed, num_blocks), 32)
    rows = num_blocks * block_rows
    total = rows * LANE
    pad_tail_is_inert = True  # x = 0, y = 0 contributes 0 to every accumulated sum

    # Scores: write src/tgt straight into a zero-padded flat buffer (two
    # static-slice in-place updates; no concat copy, no pad copy).
    scores_flat = jnp.zeros((total,), jnp.float32)
    scores_flat = scores_flat.at[:n_src].set(src_scores.astype(jnp.float32))
    scores_flat = scores_flat.at[n_src:n].set(tgt_scores.astype(jnp.float32))

    # Labels: scatter ones directly into a pre-padded int8 zeros buffer.
    # (torch.unique is a no-op here: scattering a constant is idempotent.)
    # TODO(synk): JAX .at[].set silently drops out-of-range indices whereas
    # torch indexing would error; semantics otherwise identical.
    labels_flat = jnp.zeros((total,), jnp.int8)
    labels_flat = labels_flat.at[src_corr_indices].set(1)
    labels_flat = labels_flat.at[tgt_corr_indices + n_src].set(1)

    scores2d = scores_flat.reshape(rows, LANE)
    labels2d = labels_flat.reshape(rows, LANE)

    out = _overlap_loss_call(scores2d, labels2d, block_rows, n, weight)
    return out[0], out[1], out[2]


def _reference(src_corr_indices, tgt_corr_indices, src_scores, tgt_scores,
               weight=1.0):
    """Pure-JAX reference (two-log torch formulation) for sanity checking."""
    src_labels = jnp.zeros_like(src_scores).at[src_corr_indices].set(1.0)
    tgt_labels = jnp.zeros_like(tgt_scores).at[tgt_corr_indices].set(1.0)
    scores = jnp.concatenate([src_scores, tgt_scores], axis=0)
    labels = jnp.concatenate([src_labels, tgt_labels], axis=0)
    log_x = jnp.maximum(jnp.log(scores), LOG_CLAMP)
    log_1mx = jnp.maximum(jnp.log(1.0 - scores), LOG_CLAMP)
    bce = -(labels * log_x + (1.0 - labels) * log_1mx)
    w_neg = jnp.mean(labels)
    w_pos = 1.0 - w_neg
    w = labels * w_pos + (1.0 - labels) * w_neg
    loss = weight * jnp.mean(w * bce)
    pred = (scores > 0.5).astype(jnp.float32)
    tp = jnp.sum(pred * labels)
    precision = tp / (jnp.sum(pred) + EPS)
    recall = tp / (jnp.sum(labels) + EPS)
    return loss, precision, recall


def _check(key, n_src, n_tgt, n_corr, weight, max_block_rows=MAX_BLOCK_ROWS):
    k1, k2, k3, k4 = jax.random.split(key, 4)
    src_scores = jax.random.uniform(k1, (n_src,), jnp.float32, 0.01, 0.99)
    tgt_scores = jax.random.uniform(k2, (n_tgt,), jnp.float32, 0.01, 0.99)
    src_corr_indices = jax.random.randint(k3, (n_corr,), 0, n_src, jnp.int32)
    tgt_corr_indices = jax.random.randint(k4, (n_corr,), 0, n_tgt, jnp.int32)

    loss, precision, recall = overlap_loss(
        src_corr_indices, tgt_corr_indices, src_scores, tgt_scores,
        weight=weight, max_block_rows=max_block_rows)
    jax.block_until_ready((loss, precision, recall))

    ref_loss, ref_p, ref_r = _reference(
        src_corr_indices, tgt_corr_indices, src_scores, tgt_scores, weight=weight)
    assert jnp.allclose(loss, ref_loss, rtol=1e-4, atol=1e-5), (loss, ref_loss)
    assert jnp.allclose(precision, ref_p, rtol=1e-4, atol=1e-5), (precision, ref_p)
    assert jnp.allclose(recall, ref_r, rtol=1e-4, atol=1e-5), (recall, ref_r)


if __name__ == "__main__":
    key = jax.random.PRNGKey(0)
    k_small, k_multi = jax.random.split(key, 2)

    cfg_weight = 1.0  # cfg.loss.overlap_loss.weight (deterministic, in-script)

    # Small Predator-style inputs: single (rows, 128) block, grid=(1,), fused epilogue.
    _check(k_small, n_src=100, n_tgt=120, n_corr=64, weight=cfg_weight)

    # Multi-block streaming path (grid > 1): force small tiles to exercise the
    # init/accumulate/finalize phases without huge test arrays.
    _check(k_multi, n_src=9000, n_tgt=8500, n_corr=512, weight=cfg_weight,
           max_block_rows=64)

    print("KERNEL_OK")
</pallas_src>

<mosaic_0001>
module attributes {stable_mosaic.version = 11 : i64} {
  func.func @_overlap_loss_kernel(%arg0: i32, %arg1: memref<32x128xf32, #tpu.memory_space<vmem>>, %arg2: memref<32x128xi8, #tpu.memory_space<vmem>>, %arg3: memref<4xf32, #tpu.memory_space<smem>>, %arg4: memref<5x8x128xf32, #tpu.memory_space<vmem>>) attributes {dimension_semantics = [#tpu.dimension_semantics<arbitrary>], iteration_bounds = array<i64: 1>, scalar_prefetch = 0 : i64, scratch_operands = 1 : i64, tpu.core_type = #tpu.core_type<tc>, window_params = [{transform_indices = @transform_0, window_bounds = array<i64: 32, 128>}, {transform_indices = @transform_1, window_bounds = array<i64: 32, 128>}, {transform_indices = @transform_2, window_bounds = array<i64: 4>}]} {
    %c0_i32 = arith.constant 0 : i32
    %0 = arith.cmpi eq, %arg0, %c0_i32 : i32
    %1 = arith.extui %0 : i1 to i32
    %c0_i32_0 = arith.constant 0 : i32
    %2 = arith.cmpi ne, %1, %c0_i32_0 : i32
    scf.if %2 {
      %cst_44 = arith.constant 0.000000e+00 : f32
      %67 = vector.broadcast %cst_44 : f32 to vector<5x8x128xf32>
      %c0_45 = arith.constant 0 : index
      %c0_46 = arith.constant 0 : index
      %c0_47 = arith.constant 0 : index
      %68 = vector.load %arg4[%c0_45, %c0_46, %c0_47] : memref<5x8x128xf32, #tpu.memory_space<vmem>>, vector<5x8x128xf32>
      tpu.vector_store %arg4[%c0_45, %c0_46, %c0_47], %67 {strides = array<i32>} : memref<5x8x128xf32, #tpu.memory_space<vmem>>, vector<5x8x128xf32>,
    } else {
    }
    %c0 = arith.constant 0 : index
    %c0_1 = arith.constant 0 : index
    %3 = vector.load %arg1[%c0, %c0_1] : memref<32x128xf32, #tpu.memory_space<vmem>>, vector<32x128xf32>
    %c0_2 = arith.constant 0 : index
    %c0_3 = arith.constant 0 : index
    %4 = vector.load %arg2[%c0_2, %c0_3] : memref<32x128xi8, #tpu.memory_space<vmem>>, vector<32x128xi8>
    %5 = arith.sitofp %4 : vector<32x128xi8> to vector<32x128xf32>
    %cst = arith.constant 5.000000e-01 : f32
    %6 = vector.broadcast %cst : f32 to vector<32x128xf32>
    %7 = arith.cmpf ogt, %5, %6 : vector<32x128xf32>
    %cst_4 = arith.constant 1.000000e+00 : f32
    %8 = vector.broadcast %cst_4 : f32 to vector<32x128xf32>
    %9 = arith.subf %8, %3 : vector<32x128xf32>
    %10 = arith.select %7, %3, %9 : vector<32x128xi1>, vector<32x128xf32>
    %11 = math.log %10 : vector<32x128xf32>
    %cst_5 = arith.constant -1.000000e+02 : f32
    %12 = vector.broadcast %cst_5 : f32 to vector<32x128xf32>
    %13 = arith.maximumf %11, %12 : vector<32x128xf32>
    %cst_6 = arith.constant 0.000000e+00 : f32
    %14 = vector.broadcast %cst_6 : f32 to vector<32x128xf32>
    %15 = arith.subf %14, %13 : vector<32x128xf32>
    %cst_7 = arith.constant 5.000000e-01 : f32
    %16 = vector.broadcast %cst_7 : f32 to vector<32x128xf32>
    %17 = arith.cmpf ogt, %3, %16 : vector<32x128xf32>
    %cst_8 = arith.constant 1.000000e+00 : f32
    %cst_9 = arith.constant 0.000000e+00 : f32
    %18 = vector.broadcast %cst_8 : f32 to vector<32x128xf32>
    %19 = vector.broadcast %cst_9 : f32 to vector<32x128xf32>
    %20 = arith.select %17, %18, %19 : vector<32x128xi1>, vector<32x128xf32>
    %cst_10 = arith.constant 0.000000e+00 : f32
    %21 = vector.broadcast %cst_10 : f32 to vector<32x128xf32>
    %22 = arith.select %17, %5, %21 : vector<32x128xi1>, vector<32x128xf32>
    %c0_11 = arith.constant 0 : index
    %c0_12 = arith.constant 0 : index
    %c0_13 = arith.constant 0 : index
    %23 = vector.load %arg4[%c0_11, %c0_12, %c0_13] : memref<5x8x128xf32, #tpu.memory_space<vmem>>, vector<1x8x128xf32>
    %24 = vector.shape_cast %23 : vector<1x8x128xf32> to vector<8x128xf32>
    %25 = vector.shape_cast %5 : vector<32x128xf32> to vector<4x8x128xf32>
    %cst_14 = arith.constant dense<0.000000e+00> : vector<8x128xf32>
    %26 = vector.multi_reduction <add>, %25, %cst_14 [0] : vector<4x8x128xf32> to vector<8x128xf32>
    %27 = arith.addf %24, %26 : vector<8x128xf32>
    %c0_15 = arith.constant 0 : index
    %c0_16 = arith.constant 0 : index
    %c0_17 = arith.constant 0 : index
    %28 = vector.load %arg4[%c0_15, %c0_16, %c0_17] : memref<5x8x128xf32, #tpu.memory_space<vmem>>, vector<1x8x128xf32>
    %29 = vector.shape_cast %28 : vector<1x8x128xf32> to vector<8x128xf32>
    %30 = vector.shape_cast %27 : vector<8x128xf32> to vector<1x8x128xf32>
    tpu.vector_store %arg4[%c0_15, %c0_16, %c0_17], %30 {strides = array<i32>} : memref<5x8x128xf32, #tpu.memory_space<vmem>>, vector<1x8x128xf32>,
    %c1 = arith.constant 1 : index
    %c0_18 = arith.constant 0 : index
    %c0_19 = arith.constant 0 : index
    %31 = vector.load %arg4[%c1, %c0_18, %c0_19] : memref<5x8x128xf32, #tpu.memory_space<vmem>>, vector<1x8x128xf32>
    %32 = vector.shape_cast %31 : vector<1x8x128xf32> to vector<8x128xf32>
    %33 = vector.shape_cast %15 : vector<32x128xf32> to vector<4x8x128xf32>
    %cst_20 = arith.constant dense<0.000000e+00> : vector<8x128xf32>
    %34 = vector.multi_reduction <add>, %33, %cst_20 [0] : vector<4x8x128xf32> to vector<8x128xf32>
    %35 = arith.addf %32, %34 : vector<8x128xf32>
    %c1_21 = arith.constant 1 : index
    %c0_22 = arith.constant 0 : index
    %c0_23 = arith.constant 0 : index
    %36 = vector.load %arg4[%c1_21, %c0_22, %c0_23] : memref<5x8x128xf32, #tpu.memory_space<vmem>>, vector<1x8x128xf32>
    %37 = vector.shape_cast %36 : vector<1x8x128xf32> to vector<8x128xf32>
    %38 = vector.shape_cast %35 : vector<8x128xf32> to vector<1x8x128xf32>
    tpu.vector_store %arg4[%c1_21, %c0_22, %c0_23], %38 {strides = array<i32>} : memref<5x8x128xf32, #tpu.memory_space<vmem>>, vector<1x8x128xf32>,
    %c2 = arith.constant 2 : index
    %c0_24 = arith.constant 0 : index
    %c0_25 = arith.constant 0 : index
    %39 = vector.load %arg4[%c2, %c0_24, %c0_25] : memref<5x8x128xf32, #tpu.memory_space<vmem>>, vector<1x8x128xf32>
    %40 = vector.shape_cast %39 : vector<1x8x128xf32> to vector<8x128xf32>
    %41 = arith.mulf %15, %5 : vector<32x128xf32>
    %42 = vector.shape_cast %41 : vector<32x128xf32> to vector<4x8x128xf32>
    %cst_26 = arith.constant dense<0.000000e+00> : vector<8x128xf32>
    %43 = vector.multi_reduction <add>, %42, %cst_26 [0] : vector<4x8x128xf32> to vector<8x128xf32>
    %44 = arith.addf %40, %43 : vector<8x128xf32>
    %c2_27 = arith.constant 2 : index
    %c0_28 = arith.constant 0 : index
    %c0_29 = arith.constant 0 : index
    %45 = vector.load %arg4[%c2_27, %c0_28, %c0_29] : memref<5x8x128xf32, #tpu.memory_space<vmem>>, vector<1x8x128xf32>
    %46 = vector.shape_cast %45 : vector<1x8x128xf32> to vector<8x128xf32>
    %47 = vector.shape_cast %44 : vector<8x128xf32> to vector<1x8x128xf32>
    tpu.vector_store %arg4[%c2_27, %c0_28, %c0_29], %47 {strides = array<i32>} : memref<5x8x128xf32, #tpu.memory_space<vmem>>, vector<1x8x128xf32>,
    %c3 = arith.constant 3 : index
    %c0_30 = arith.constant 0 : index
    %c0_31 = arith.constant 0 : index
    %48 = vector.load %arg4[%c3, %c0_30, %c0_31] : memref<5x8x128xf32, #tpu.memory_space<vmem>>, vector<1x8x128xf32>
    %49 = vector.shape_cast %48 : vector<1x8x128xf32> to vector<8x128xf32>
    %50 = vector.shape_cast %22 : vector<32x128xf32> to vector<4x8x128xf32>
    %cst_32 = arith.constant dense<0.000000e+00> : vector<8x128xf32>
    %51 = vector.multi_reduction <add>, %50, %cst_32 [0] : vector<4x8x128xf32> to vector<8x128xf32>
    %52 = arith.addf %49, %51 : vector<8x128xf32>
    %c3_33 = arith.constant 3 : index
    %c0_34 = arith.constant 0 : index
    %c0_35 = arith.constant 0 : index
    %53 = vector.load %arg4[%c3_33, %c0_34, %c0_35] : memref<5x8x128xf32, #tpu.memory_space<vmem>>, vector<1x8x128xf32>
    %54 = vector.shape_cast %53 : vector<1x8x128xf32> to vector<8x128xf32>
    %55 = vector.shape_cast %52 : vector<8x128xf32> to vector<1x8x128xf32>
    tpu.vector_store %arg4[%c3_33, %c0_34, %c0_35], %55 {strides = array<i32>} : memref<5x8x128xf32, #tpu.memory_space<vmem>>, vector<1x8x128xf32>,
    %c4 = arith.constant 4 : index
    %c0_36 = arith.constant 0 : index
    %c0_37 = arith.constant 0 : index
    %56 = vector.load %arg4[%c4, %c0_36, %c0_37] : memref<5x8x128xf32, #tpu.memory_space<vmem>>, vector<1x8x128xf32>
    %57 = vector.shape_cast %56 : vector<1x8x128xf32> to vector<8x128xf32>
    %58 = vector.shape_cast %20 : vector<32x128xf32> to vector<4x8x128xf32>
    %cst_38 = arith.constant dense<0.000000e+00> : vector<8x128xf32>
    %59 = vector.multi_reduction <add>, %58, %cst_38 [0] : vector<4x8x128xf32> to vector<8x128xf32>
    %60 = arith.addf %57, %59 : vector<8x128xf32>
    %c4_39 = arith.constant 4 : index
    %c0_40 = arith.constant 0 : index
    %c0_41 = arith.constant 0 : index
    %61 = vector.load %arg4[%c4_39, %c0_40, %c0_41] : memref<5x8x128xf32, #tpu.memory_space<vmem>>, vector<1x8x128xf32>
    %62 = vector.shape_cast %61 : vector<1x8x128xf32> to vector<8x128xf32>
    %63 = vector.shape_cast %60 : vector<8x128xf32> to vector<1x8x128xf32>
    tpu.vector_store %arg4[%c4_39, %c0_40, %c0_41], %63 {strides = array<i32>} : memref<5x8x128xf32, #tpu.memory_space<vmem>>, vector<1x8x128xf32>,
    %c0_i32_42 = arith.constant 0 : i32
    %64 = arith.cmpi eq, %arg0, %c0_i32_42 : i32
    %65 = arith.extui %64 : i1 to i32
    %c0_i32_43 = arith.constant 0 : i32
    %66 = arith.cmpi ne, %65, %c0_i32_43 : i32
    scf.if %66 {
      %c0_44 = arith.constant 0 : index
      %c0_45 = arith.constant 0 : index
      %c0_46 = arith.constant 0 : index
      %67 = vector.load %arg4[%c0_44, %c0_45, %c0_46] : memref<5x8x128xf32, #tpu.memory_space<vmem>>, vector<1x8x128xf32>
      %68 = vector.shape_cast %67 : vector<1x8x128xf32> to vector<8x128xf32>
      %69 = vector.shape_cast %68 : vector<8x128xf32> to vector<1x8x128xf32>
      %cst_47 = arith.constant dense<0.000000e+00> : vector<1xf32>
      %70 = vector.multi_reduction <add>, %69, %cst_47 [1, 2] : vector<1x8x128xf32> to vector<1xf32>
      %71 = vector.shape_cast %70 : vector<1xf32> to vector<1x1x1xf32>
      %72 = vector.extract %71[0, 0, 0] : f32 from vector<1x1x1xf32>
      %c1_48 = arith.constant 1 : index
      %c0_49 = arith.constant 0 : index
      %c0_50 = arith.constant 0 : index
      %73 = vector.load %arg4[%c1_48, %c0_49, %c0_50] : memref<5x8x128xf32, #tpu.memory_space<vmem>>, vector<1x8x128xf32>
      %74 = vector.shape_cast %73 : vector<1x8x128xf32> to vector<8x128xf32>
      %75 = vector.shape_cast %74 : vector<8x128xf32> to vector<1x8x128xf32>
      %cst_51 = arith.constant dense<0.000000e+00> : vector<1xf32>
      %76 = vector.multi_reduction <add>, %75, %cst_51 [1, 2] : vector<1x8x128xf32> to vector<1xf32>
      %77 = vector.shape_cast %76 : vector<1xf32> to vector<1x1x1xf32>
      %78 = vector.extract %77[0, 0, 0] : f32 from vector<1x1x1xf32>
      %c2_52 = arith.constant 2 : index
      %c0_53 = arith.constant 0 : index
      %c0_54 = arith.constant 0 : index
      %79 = vector.load %arg4[%c2_52, %c0_53, %c0_54] : memref<5x8x128xf32, #tpu.memory_space<vmem>>, vector<1x8x128xf32>
      %80 = vector.shape_cast %79 : vector<1x8x128xf32> to vector<8x128xf32>
      %81 = vector.shape_cast %80 : vector<8x128xf32> to vector<1x8x128xf32>
      %cst_55 = arith.constant dense<0.000000e+00> : vector<1xf32>
      %82 = vector.multi_reduction <add>, %81, %cst_55 [1, 2] : vector<1x8x128xf32> to vector<1xf32>
      %83 = vector.shape_cast %82 : vector<1xf32> to vector<1x1x1xf32>
      %84 = vector.extract %83[0, 0, 0] : f32 from vector<1x1x1xf32>
      %c3_56 = arith.constant 3 : index
      %c0_57 = arith.constant 0 : index
      %c0_58 = arith.constant 0 : index
      %85 = vector.load %arg4[%c3_56, %c0_57, %c0_58] : memref<5x8x128xf32, #tpu.memory_space<vmem>>, vector<1x8x128xf32>
      %86 = vector.shape_cast %85 : vector<1x8x128xf32> to vector<8x128xf32>
      %87 = vector.shape_cast %86 : vector<8x128xf32> to vector<1x8x128xf32>
      %cst_59 = arith.constant dense<0.000000e+00> : vector<1xf32>
      %88 = vector.multi_reduction <add>, %87, %cst_59 [1, 2] : vector<1x8x128xf32> to vector<1xf32>
      %89 = vector.shape_cast %88 : vector<1xf32> to vector<1x1x1xf32>
      %90 = vector.extract %89[0, 0, 0] : f32 from vector<1x1x1xf32>
      %c4_60 = arith.constant 4 : index
      %c0_61 = arith.constant 0 : index
      %c0_62 = arith.constant 0 : index
      %91 = vector.load %arg4[%c4_60, %c0_61, %c0_62] : memref<5x8x128xf32, #tpu.memory_space<vmem>>, vector<1x8x128xf32>
      %92 = vector.shape_cast %91 : vector<1x8x128xf32> to vector<8x128xf32>
      %93 = vector.shape_cast %92 : vector<8x128xf32> to vector<1x8x128xf32>
      %cst_63 = arith.constant dense<0.000000e+00> : vector<1xf32>
      %94 = vector.multi_reduction <add>, %93, %cst_63 [1, 2] : vector<1x8x128xf32> to vector<1xf32>
      %95 = vector.shape_cast %94 : vector<1xf32> to vector<1x1x1xf32>
      %96 = vector.extract %95[0, 0, 0] : f32 from vector<1x1x1xf32>
      %97 = arith.subf %78, %84 : f32
      %cst_64 = arith.constant 2.200000e+02 : f32
      %98 = arith.divf %72, %cst_64 : f32
      %cst_65 = arith.constant 1.000000e+00 : f32
      %99 = arith.subf %cst_65, %98 : f32
      %100 = arith.mulf %99, %84 : f32
      %101 = arith.mulf %98, %97 : f32
      %102 = arith.addf %100, %101 : f32
      %cst_66 = arith.constant 1.000000e+00 : f32
      %103 = arith.mulf %cst_66, %102 : f32
      %cst_67 = arith.constant 2.200000e+02 : f32
      %104 = arith.divf %103, %cst_67 : f32
      %c0_68 = arith.constant 0 : index
      %105 = memref.load %arg3[%c0_68] : memref<4xf32, #tpu.memory_space<smem>>
      memref.store %104, %arg3[%c0_68] : memref<4xf32, #tpu.memory_space<smem>>
      %cst_69 = arith.constant 9.99999993E-9 : f32
      %106 = arith.addf %96, %cst_69 : f32
      %107 = arith.divf %90, %106 : f32
      %c1_70 = arith.constant 1 : index
      %108 = memref.load %arg3[%c1_70] : memref<4xf32, #tpu.memory_space<smem>>
      memref.store %107, %arg3[%c1_70] : memref<4xf32, #tpu.memory_space<smem>>
      %cst_71 = arith.constant 9.99999993E-9 : f32
      %109 = arith.addf %72, %cst_71 : f32
      %110 = arith.divf %90, %109 : f32
      %c2_72 = arith.constant 2 : index
      %111 = memref.load %arg3[%c2_72] : memref<4xf32, #tpu.memory_space<smem>>
      memref.store %110, %arg3[%c2_72] : memref<4xf32, #tpu.memory_space<smem>>
      %cst_73 = arith.constant 0.000000e+00 : f32
      %c3_74 = arith.constant 3 : index
      %112 = memref.load %arg3[%c3_74] : memref<4xf32, #tpu.memory_space<smem>>
      memref.store %cst_73, %arg3[%c3_74] : memref<4xf32, #tpu.memory_space<smem>>
    } else {
    }
    return
  }
  func.func @transform_0(%arg0: i32) -> (i32, i32) {
    %c0_i32 = arith.constant 0 : i32
    %c0_i32_0 = arith.constant 0 : i32
    return %arg0, %c0_i32 : i32, i32
  }
  func.func @transform_1(%arg0: i32) -> (i32, i32) {
    %c0_i32 = arith.constant 0 : i32
    %c0_i32_0 = arith.constant 0 : i32
    return %arg0, %c0_i32 : i32, i32
  }
  func.func @transform_2(%arg0: i32) -> i32 {
    %c0_i32 = arith.constant 0 : i32
    %c0_i32_0 = arith.constant 0 : i32
    return %c0_i32 : i32
  }
}

</mosaic_0001>

<bundles_post_ra>
// kernel: overlap_loss.1
= control target key start
LH: loop header
LB: loop body
LE: loop exit
PB: predicated region body
PF: predicated region fallthrough
CT: control target
= control target key end

     0   :  { %s315_s0 = inlined_call_operand.vmem [shape: f32[32,128], index: 0, kind: input, shape index: {}]   ;;  %s316_s1 = inlined_call_operand.vmem [shape: s8[32,128], index: 1, kind: input, shape index: {}]   ;;  %s317_s2 = inlined_call_operand.vmem [shape: f32[4], index: 2, kind: output, shape index: {}]  }
   0x1   :  { %v213_v0 = vld [vmem:[%s316_s1] sm:$0xff]   ;;  %v22_v2 = vld [vmem:[%s315_s0 + $0x8] sm:$0xff]  ;;  %v23_v7 = vld [vmem:[%s315_s0 + $0x10] sm:$0xff] }
   0x2   :  { %v21_v1 = vld [vmem:[%s315_s0] sm:$0xff]  ;;  %v214_v3 = vunpack.c.0.s8 %v213_v0  ;;  %v215_v4 = vunpack.c.1.s8 %v213_v0  ;;  %v218_v5 = vunpack.c.2.s8 %v213_v0  ;;  %v219_v6 = vunpack.c.3.s8 %v213_v0  ;;  %v297_v8 = vld [vmem:[%s315_s0 + $0x18] sm:$0xff] }
   0x3   :  { %7 = vsyncpa [#allocation4], 0  ;;  %v41_v9 = vsub.f32 1.0, %v21_v1  ;;  %v42_v10 = vsub.f32 1.0, %v22_v2  ;;  %v43_v11 = vsub.f32 1.0, %v23_v7  ;;  %v44_v12 = vsub.f32 1.0, %v297_v8 }
   0x4   :  { %v33_v13 = vcvt.s32.f32 %v214_v3  ;;  %v34_v14 = vcvt.s32.f32 %v215_v4  ;;  %v35_v15 = vcvt.s32.f32 %v218_v5  ;;  %v36_v16 = vcvt.s32.f32 %v219_v6  ;;  %s265_s0 = smov 0.0   ;;  %s203_s6 = sshll.u32 %s317_s2, 4  ;;  %s204_s6 = int_to_ptr.vmem [resolvable:$true] %s203_s6 }
   0x5   :  { %vm65_vm4 = vcmp.gt.f32.partialorder %v21_v1, 0.5  ;;  %vm66_vm5 = vcmp.gt.f32.partialorder %v22_v2, 0.5  ;;  %v264_v32 = vmov 0.0   ;;  %vm67_vm6 = vcmp.gt.f32.partialorder %v23_v7, 0.5  ;;  %196 = sst [smem:[#allocation3 + $0x3]] %s265_s0  ;;  %s250_s11 = scalar_lea.vmem %s204_s6, 16 }
   0x6   :  { %v78_v17 = vadd.f32 %v34_v14, %v33_v13  ;;  %vm37_vm0 = vcmp.gt.f32.partialorder %v33_v13, 0.5  ;;  %vm38_vm1 = vcmp.gt.f32.partialorder %v34_v14, 0.5  ;;  %vm39_vm2 = vcmp.gt.f32.partialorder %v35_v15, 0.5  ;;  %p251_p0 = scmp.ne.s32.totalorder %s204_s6, %s250_s11  ;;  %p255_p1 = scmp.lt.s32.totalorder %s204_s6, %s204_s6 }
   0x7   :  { %vm40_vm3 = vcmp.gt.f32.partialorder %v36_v16, 0.5  ;;  %v45_v18 = vsel %vm37_vm0, %v21_v1, %v41_v9  ;;  %v46_v19 = vsel %vm38_vm1, %v22_v2, %v42_v10  ;;  %v47_v20 = vsel %vm39_vm2, %v23_v7, %v43_v11  ;;  %p256_p2 = scmp.lt.s32.totalorder %s250_s11, %s250_s11 }
   0x8   :  { %v79_v21 = vadd.f32 %v78_v17, %v35_v15  ;;  %v48_v22 = vsel %vm40_vm3, %v297_v8, %v44_v12  ;;  %238 = vlog2.f32 %v45_v18  ;;  %v69_v33 = vsel %vm65_vm4, 1.0, %v264_v32 }
   0x9   :  { %240 = vlog2.f32 %v46_v19  ;;  %v70_v34 = vsel %vm66_vm5, 1.0, %v264_v32  ;;  %v73_v39 = vsel %vm65_vm4, %v33_v13, 0.0  ;;  %v74_v40 = vsel %vm66_vm5, %v34_v14, 0.0  ;;  %p257_p3 = por %p256_p2, %p255_p1 }
   0xa   :  { %v80_v23 = vadd.f32 %v79_v21, %v36_v16  ;;  %242 = vlog2.f32 %v47_v20  ;;  %v110_v43 = vadd.f32 %v70_v34, %v69_v33  ;;  %vm68_vm7 = vcmp.gt.f32.partialorder %v297_v8, 0.5 }
   0xb   :  { %244 = vlog2.f32 %v48_v22  ;;  %v71_v46 = vsel %vm67_vm6, 1.0, %v264_v32  ;;  %v103_v50 = vadd.f32 %v74_v40, %v73_v39  ;;  %v75_v52 = vsel %vm67_vm6, %v35_v15, 0.0  ;;  %p258_p4 = pnand %p257_p3, %p251_p0 }
   0xc   :  { %119 = vadd.xlane.f32.xlu0 %v80_v23  ;;  %v111_v56 = vadd.f32 %v110_v43, %v71_v46  ;;  %v72_v57 = vsel %vm68_vm7, 1.0, %v264_v32  ;;  %v76_v61 = vsel %vm68_vm7, %v36_v16, 0.0 }
   0xd   :  { %v104_v60 = vadd.f32 %v103_v50, %v75_v52 }
   0xe   :  { %v112_v63 = vadd.f32 %v111_v56, %v72_v57 }
   0xf   :  { %v105_v0 = vadd.f32 %v104_v60, %v76_v61 }
  0x12   :  { %v239_v24 = vpop.eup %238 }
  0x13   :  { %v241_v25 = vpop.eup %240  ;;  %v50_v26 = vmul.f32 0.6931472, %v239_v24 }
  0x14   :  { %v243_v27 = vpop.eup %242  ;;  %v52_v28 = vmul.f32 0.6931472, %v241_v25 }
  0x15   :  { %v245_v29 = vpop.eup %244  ;;  %v54_v30 = vmul.f32 0.6931472, %v243_v27  ;;  %v57_v31 = vmax.f32 %v50_v26, -100.0 }
  0x16   :  { %v56_v35 = vmul.f32 0.6931472, %v245_v29  ;;  %v58_v36 = vmax.f32 %v52_v28, -100.0 }
  0x17   :  { %v59_v37 = vmax.f32 %v54_v30, -100.0  ;;  %v61_v38 = vsub.f32 0.0, %v57_v31 }
  0x18   :  { %v60_v41 = vmax.f32 %v56_v35, -100.0  ;;  %v62_v42 = vsub.f32 0.0, %v58_v36 }
  0x19   :  { %v63_v44 = vsub.f32 0.0, %v59_v37  ;;  %v92_v45 = vmul.f32 %v61_v38, %v33_v13 }
  0x1a   :  { %v64_v47 = vsub.f32 0.0, %v60_v41  ;;  %v85_v48 = vadd.f32 %v62_v42, %v61_v38  ;;  %v93_v49 = vmul.f32 %v62_v42, %v34_v14 }
  0x1b   :  { %v94_v51 = vmul.f32 %v63_v44, %v35_v15 }
  0x1c   :  { %v86_v53 = vadd.f32 %v85_v48, %v63_v44  ;;  %v95_v54 = vmul.f32 %v64_v47, %v36_v16  ;;  %v96_v55 = vadd.f32 %v93_v49, %v92_v45 }
  0x1e   :  { %v87_v58 = vadd.f32 %v86_v53, %v64_v47  ;;  %v97_v59 = vadd.f32 %v96_v55, %v94_v51 }
  0x20   :  { %129 = vadd.xlane.f32.xlu0 %v87_v58  ;;  %v98_v62 = vadd.f32 %v97_v59, %v95_v54 }
  0x22   :  { %139 = vadd.xlane.f32.xlu1 %v98_v62 }
  0x24   :  { %159 = vadd.xlane.f32.xlu0 %v112_v63 }
  0x26   :  { %149 = vadd.xlane.f32.xlu1 %v105_v0 }
  0x99   :  { %v120_v1 = vpop.xlane.xlu0 %119 }
  0x9a   :  { %v121_v2 = vrot.slane %v120_v1, 4 }
  0x9c   :  { %v122_v3 = vadd.f32 %v121_v2, %v120_v1 }
  0x9e   :  { %v123_v4 = vrot.slane %v122_v3, 2 }
  0xa0   :  { %v124_v5 = vadd.f32 %v123_v4, %v122_v3 }
  0xa2   :  { %v125_v6 = vrot.slane %v124_v5, 1 }
  0xa4   :  { %v126_v7 = vadd.f32 %v125_v6, %v124_v5 }
  0xa6   :  { %221 = vpush %v126_v7 }
  0xad   :  { %v130_v9 = vpop.xlane.xlu0 %129 }
  0xae   :  { %v131_v10 = vrot.slane %v130_v9, 4 }
  0xaf   :  { %v140_v11 = vpop.xlane.xlu1 %139 }
  0xb0   :  { %v132_v8 = vadd.f32 %v131_v10, %v130_v9  ;;  %v141_v12 = vrot.slane %v140_v11, 4 }
  0xb1   :  { %v160_v13 = vpop.xlane.xlu0 %159 }
  0xb2   :  { %v133_v14 = vrot.slane %v132_v8, 2  ;;  %v142_v15 = vadd.f32 %v141_v12, %v140_v11  ;;  %v161_v16 = vrot.slane %v160_v13, 4 }
  0xb3   :  { %v150_v17 = vpop.xlane.xlu1 %149 }
  0xb4   :  { %v143_v18 = vrot.slane %v142_v15, 2  ;;  %v162_v19 = vadd.f32 %v161_v16, %v160_v13  ;;  %v151_v20 = vrot.slane %v150_v17, 4  ;;  %v134_v21 = vadd.f32 %v133_v14, %v132_v8 }
  0xb6   :  { %v163_v22 = vrot.slane %v162_v19, 2  ;;  %v152_v23 = vadd.f32 %v151_v20, %v150_v17  ;;  %v135_v24 = vrot.slane %v134_v21, 1  ;;  %v144_v25 = vadd.f32 %v143_v18, %v142_v15 }
  0xb8   :  { %v164_v26 = vadd.f32 %v163_v22, %v162_v19  ;;  %v153_v27 = vrot.slane %v152_v23, 2  ;;  %v136_v28 = vadd.f32 %v135_v24, %v134_v21  ;;  %v145_v29 = vrot.slane %v144_v25, 1 }
  0xba   :  { %v154_v30 = vadd.f32 %v153_v27, %v152_v23  ;;  %223 = vpush %v136_v28  ;;  %v146_v31 = vadd.f32 %v145_v29, %v144_v25  ;;  %v165_v32 = vrot.slane %v164_v26, 1 }
  0xbc   :  { %225 = vpush %v146_v31  ;;  %v155_v33 = vrot.slane %v154_v30, 1  ;;  %v166_v35 = vadd.f32 %v165_v32, %v164_v26 }
  0xbe   :  { %v156_v34 = vadd.f32 %v155_v33, %v154_v30 }
  0xc0   :  { %227 = vpush %v156_v34 }
  0xc1   :  { %229 = vpush %v166_v35 }
  0xd7   :  { %s222_s1 = spop %221 }
  0xd8   :  { %s171_s19 = smul.f32 0.0045454544, %s222_s1  ;;  %s188_s25 = sadd.f32 1e-08, %s222_s1 }
  0xda   :  { %s172_s22 = ssub.f32 1.0, %s171_s19  ;;  %v189_v36 = vstv %s188_s25 }
  0xeb   :  { %s224_s20 = spop %223 }
  0xed   :  { %s226_s21 = spop %225 }
  0xee   :  { %s168_s23 = ssub.f32 %s224_s20, %s226_s21  ;;  %s173_s24 = smul.f32 %s226_s21, %s172_s22 }
  0xf0   :  { %s174_s26 = smul.f32 %s171_s19, %s168_s23 }
  0xf1   :  { %s228_s27 = spop %227 }
  0xf2   :  { %s175_s28 = sadd.f32 %s174_s26, %s173_s24  ;;  %s230_s29 = spop %229 }
  0xf3   :  { %s181_s30 = sadd.f32 1e-08, %s230_s29 }
  0xf4   :  { %s178_s3 = smul.f32 0.0045454544, %s175_s28 }
  0xf5   :  { %v182_v37 = vstv %s181_s30 }
  0xf6   :  { %180 = sst [smem:[#allocation3]] %s178_s3  ;;  %246 = vrcp.f32 %v182_v37 }
  0xf7   :  { %248 = vrcp.f32 %v189_v36 }
 0x100   :  { %v247_v38 = vpop.eup %246 }
 0x101   :  { %v249_v39 = vpop.eup %248  ;;  %231 = vpush %v247_v38 }
 0x102   :  { %233 = vpush %v249_v39 }
 0x132   :  { %s232_s7 = spop %231 }
 0x133   :  { %s185_s8 = smul.f32 %s232_s7, %s228_s27  ;;  %s234_s9 = spop %233 }
 0x134   :  { %s192_s10 = smul.f32 %s234_s9, %s228_s27 }
 0x135   :  { %187 = sst [smem:[#allocation3 + $0x1]] %s185_s8 }
 0x136   :  { %194 = sst [smem:[#allocation3 + $0x2]] %s192_s10 }
 0x137   :  { %261 = shalt.err (!%p258_p4)
}
 0x138   :  { %s266_s12 = smov [#allocation3]  }
 0x139   :  { %206 = dma.smem_to_vmem %s266_s12, 16, %s204_s6, [#allocation4]  }
 0x13a   :  { %262 = dma.done.wait [#allocation4], 16  }
 0x13b   :  { %263 = vsyncadd [#allocation4], 4294967280 }
 0x13c   :  { %210 = sfence }
 0x13d   :  { %211 = vsyncpa [#allocation4], 1 }

</bundles_post_ra>
